<compile_context>
chip_gen: v5e
topology: v5e:2x2
jax: 0.10.0
libtpu: 0.0.40
codegen_flags: <defaults>
</compile_context>

<pallas_src>
import functools

import jax
import jax.numpy as jnp
from jax.experimental import pallas as pl
from jax.experimental.pallas import tpu as pltpu

BOTTLENECK = 256
COMPRESSED = 32
SNR_DB = 10.0

# Tile sized for v7x (64 MiB physical / 32 MiB scoped VMEM):
#   2 bufs * TILE_B * (256 + 32) * 4 B  +  ~33 KB weights  ~= 9.5 MB at TILE_B=4096.
TILE_B = 4096


def channel_encoder_kernel(x_ref, w_ref, b_ref, out_ref):
    """One batch tile: out = x @ W_eff + b_eff.

    x_ref  : (TILE_B, 256) VMEM
    w_ref  : (256, 32)     VMEM (resident across grid steps)
    b_ref  : (1, 32)       VMEM
    out_ref: (TILE_B, 32)  VMEM
    """
    out_ref[...] = (
        jnp.dot(x_ref[...], w_ref[...], preferred_element_type=jnp.float32)
        + b_ref[...]
    ).astype(out_ref.dtype)


def _fold_params(params, snr_db):
    """Collapse the purely-affine encoder into (W_eff, b_eff).

    forward:  x2 = fc2(fc1(fc0(f)))
              s  = snr_encoder(ones*snr_db)          (batch-independent)
              out = fc6(fc5(fc4(fc3(x2 + s))))
    =>        out = f @ W_eff + b_eff
    """
    fcw, fcb = params["fcw"], params["fcb"]          # (6,32,32), (6,32): fc1..fc6

    # snr_encoder: Linear(1,32) -> ReLU -> Linear(32,32); input is ones(B,1)*snr_db.
    s = jnp.maximum(snr_db * params["sw1"] + params["sb1"], 0.0)        # (1, 32)
    snr_feat = s @ params["sw2"] + params["sb2"]                        # (1, 32)

    # Pre chain: fc0 (256->32), fc1, fc2.
    w_pre = params["w0"] @ fcw[0] @ fcw[1]                              # (256, 32)
    b_pre = (params["b0"] @ fcw[0] + fcb[0][None, :]) @ fcw[1] + fcb[1][None, :]

    # Post chain: fc3, fc4, fc5, fc6.
    w_post = fcw[2] @ fcw[3] @ fcw[4] @ fcw[5]                          # (32, 32)
    b_post = (
        ((fcb[2][None, :] @ fcw[3] + fcb[3][None, :]) @ fcw[4] + fcb[4][None, :])
        @ fcw[5]
        + fcb[5][None, :]
    )                                                                   # (1, 32)

    w_eff = w_pre @ w_post                                              # (256, 32)
    b_eff = (b_pre + snr_feat) @ w_post + b_post                        # (1, 32)
    return w_eff, b_eff


@jax.jit
def channel_encoder(f, params, snr_db=SNR_DB):
    B = f.shape[0]
    w_eff, b_eff = _fold_params(params, snr_db)

    tb = min(TILE_B, B)
    grid = (pl.cdiv(B, tb),)

    return pl.pallas_call(
        channel_encoder_kernel,
        out_shape=jax.ShapeDtypeStruct((B, COMPRESSED), jnp.float32),
        grid=grid,
        in_specs=[
            pl.BlockSpec((tb, BOTTLENECK), lambda i: (i, 0)),           # x tile
            pl.BlockSpec((BOTTLENECK, COMPRESSED), lambda i: (0, 0)),   # W_eff
            pl.BlockSpec((1, COMPRESSED), lambda i: (0, 0)),            # b_eff
        ],
        out_specs=pl.BlockSpec((tb, COMPRESSED), lambda i: (i, 0)),
        compiler_params=pltpu.CompilerParams(
            dimension_semantics=("parallel",),      # shard batch tiles over 2 TCs on v7x
            vmem_limit_bytes=32 * 1024 * 1024,
        ),
        cost_estimate=pl.CostEstimate(
            flops=2 * B * BOTTLENECK * COMPRESSED,
            transcendentals=0,
            bytes_accessed=B * (BOTTLENECK + COMPRESSED) * 4
            + (BOTTLENECK * COMPRESSED + COMPRESSED) * 4,
        ),
    )(f, w_eff, b_eff)


def init_params(key):
    """Deterministic synthetic params, PyTorch-style uniform(-1/sqrt(in), 1/sqrt(in)).

    PyTorch Linear stores weight as (out, in); we store the transpose (in, out)
    so everything computes x @ W + b directly.
    """
    keys = jax.random.split(key, 20)
    ki = iter(keys)

    def lin(in_f, out_f):
        bound = 1.0 / jnp.sqrt(jnp.float32(in_f))
        w = jax.random.uniform(next(ki), (in_f, out_f), jnp.float32, -bound, bound)
        b = jax.random.uniform(next(ki), (1, out_f), jnp.float32, -bound, bound)
        return w, b

    # fc_layers[0]: Linear(256, 32)
    w0, b0 = lin(BOTTLENECK, COMPRESSED)            # (256, 32), (1, 32)

    # fc_layers[1..6]: Linear(32, 32)
    ws, bs = [], []
    for _ in range(6):
        w, b = lin(COMPRESSED, COMPRESSED)
        ws.append(w)
        bs.append(b[0])
    fcw = jnp.stack(ws, axis=0)                     # (6, 32, 32)
    fcb = jnp.stack(bs, axis=0)                     # (6, 32)

    # snr_encoder: Linear(1, 32), ReLU, Linear(32, 32)
    sw1, sb1 = lin(1, 32)                           # (1, 32), (1, 32)
    sw2, sb2 = lin(32, COMPRESSED)                  # (32, 32), (1, 32)

    return dict(w0=w0, b0=b0, fcw=fcw, fcb=fcb,
                sw1=sw1, sb1=sb1, sw2=sw2, sb2=sb2)


def reference_forward(f, params, snr_db=SNR_DB):
    """Layer-by-layer JAX mirror of the PyTorch ChannelEncoder.forward."""
    h = f @ params["w0"] + params["b0"]                       # fc_layers[0]
    for i in range(0, 2):                                     # fc_layers[1..2]
        h = h @ params["fcw"][i] + params["fcb"][i][None, :]
    snr_info = jnp.ones((f.shape[0], 1), jnp.float32) * snr_db
    s = jnp.maximum(snr_info @ params["sw1"] + params["sb1"], 0.0)
    s = s @ params["sw2"] + params["sb2"]                     # snr_encoder
    h = (h + s) @ params["fcw"][2] + params["fcb"][2][None, :]  # fc_layers[3]
    for i in range(3, 6):                                     # fc_layers[4..6]
        h = h @ params["fcw"][i] + params["fcb"][i][None, :]
    return h


if __name__ == "__main__":
    key = jax.random.PRNGKey(0)
    k_param, k_x = jax.random.split(key)

    B = 64  # small demo batch; features = BOTTLENECK = 256
    params = init_params(k_param)
    f = jax.random.normal(k_x, (B, BOTTLENECK), jnp.float32)

    out = channel_encoder(f, params, SNR_DB)
    out = jax.block_until_ready(out)

    ref = reference_forward(f, params, SNR_DB)
    assert out.shape == (B, COMPRESSED), out.shape
    # Affine collapse changes fp32 summation order -> allow small tolerance.
    assert jnp.allclose(out, ref, atol=1e-4, rtol=1e-4), "mismatch vs JAX reference"

    print("KERNEL_OK")
</pallas_src>

<mosaic_0001>
module attributes {stable_mosaic.version = 11 : i64} {
  func.func @channel_encoder_kernel(%arg0: i32, %arg1: memref<64x256xf32, #tpu.memory_space<vmem>>, %arg2: memref<256x32xf32, #tpu.memory_space<vmem>>, %arg3: memref<1x32xf32, #tpu.memory_space<vmem>>, %arg4: memref<64x32xf32, #tpu.memory_space<vmem>>) attributes {dimension_semantics = [#tpu.dimension_semantics<parallel>], iteration_bounds = array<i64: 1>, scalar_prefetch = 0 : i64, scratch_operands = 0 : i64, tpu.core_type = #tpu.core_type<tc>, window_params = [{transform_indices = @transform_0, window_bounds = array<i64: 64, 256>}, {pipeline_mode = #tpu.pipeline_mode<synchronous>, transform_indices = @transform_1, window_bounds = array<i64: 256, 32>}, {pipeline_mode = #tpu.pipeline_mode<synchronous>, transform_indices = @transform_2, window_bounds = array<i64: 1, 32>}, {transform_indices = @transform_3, window_bounds = array<i64: 64, 32>}]} {
    %c0 = arith.constant 0 : index
    %c0_0 = arith.constant 0 : index
    %0 = vector.load %arg1[%c0, %c0_0] : memref<64x256xf32, #tpu.memory_space<vmem>>, vector<64x256xf32>
    %c0_1 = arith.constant 0 : index
    %c0_2 = arith.constant 0 : index
    %1 = vector.load %arg2[%c0_1, %c0_2] : memref<256x32xf32, #tpu.memory_space<vmem>>, vector<256x32xf32>
    %cst = arith.constant dense<0.000000e+00> : vector<64x32xf32>
    %2 = tpu.matmul %0, %1, %cst {dimension_numbers = #tpu.dot_dimension_numbers<[1], [0], [0], [1], [0, 0, 1, 1], [], []>} : vector<64x256xf32>, vector<256x32xf32>, vector<64x32xf32> -> vector<64x32xf32>
    %c0_3 = arith.constant 0 : index
    %c0_4 = arith.constant 0 : index
    %3 = vector.load %arg3[%c0_3, %c0_4] : memref<1x32xf32, #tpu.memory_space<vmem>>, vector<1x32xf32>
    %4 = vector.broadcast %3 : vector<1x32xf32> to vector<64x32xf32>
    %5 = arith.addf %2, %4 : vector<64x32xf32>
    %c0_5 = arith.constant 0 : index
    %c0_6 = arith.constant 0 : index
    %6 = vector.load %arg4[%c0_5, %c0_6] : memref<64x32xf32, #tpu.memory_space<vmem>>, vector<64x32xf32>
    tpu.vector_store %arg4[%c0_5, %c0_6], %5 {strides = array<i32>} : memref<64x32xf32, #tpu.memory_space<vmem>>, vector<64x32xf32>,
    return
  }
  func.func @transform_0(%arg0: i32) -> (i32, i32) {
    %c0_i32 = arith.constant 0 : i32
    %c0_i32_0 = arith.constant 0 : i32
    return %arg0, %c0_i32 : i32, i32
  }
  func.func @transform_1(%arg0: i32) -> (i32, i32) {
    %c0_i32 = arith.constant 0 : i32
    %c0_i32_0 = arith.constant 0 : i32
    %c0_i32_1 = arith.constant 0 : i32
    return %c0_i32, %c0_i32_0 : i32, i32
  }
  func.func @transform_2(%arg0: i32) -> (i32, i32) {
    %c0_i32 = arith.constant 0 : i32
    %c0_i32_0 = arith.constant 0 : i32
    %c0_i32_1 = arith.constant 0 : i32
    return %c0_i32, %c0_i32_0 : i32, i32
  }
  func.func @transform_3(%arg0: i32) -> (i32, i32) {
    %c0_i32 = arith.constant 0 : i32
    %c0_i32_0 = arith.constant 0 : i32
    return %arg0, %c0_i32 : i32, i32
  }
}

</mosaic_0001>

<bundles_post_ra>
// kernel: channel_encoder.1
= control target key start
LH: loop header
LB: loop body
LE: loop exit
PB: predicated region body
PF: predicated region fallthrough
CT: control target
= control target key end

     0   :  { %vm148_vm0 = vcmask 261120   ;;  %s393_s1 = inlined_call_operand.vmem [shape: f32[256,32], index: 1, kind: input, shape index: {}]   ;;  %s394_s2 = inlined_call_operand.vmem [shape: f32[1,32], index: 2, kind: input, shape index: {}]   ;;  %s395_s0 = inlined_call_operand.vmem [shape: f32[64,256], index: 0, kind: input, shape index: {}]   ;;  %s396_s3 = inlined_call_operand.vmem [shape: f32[64,32], index: 3, kind: output, shape index: {}]  }
   0x1   :  { %v45_v0 = vld [vmem:[%s393_s1 + $0x78] sm:$0xff]  ;;  %v44_v1 = vld [vmem:[%s393_s1 + $0x70] sm:$0xff]  ;;  %v43_v4 = vld [vmem:[%s393_s1 + $0x68] sm:$0xff] }
   0x2   :  { %v61_v2 = vld [vmem:[%s393_s1 + $0xf8] sm:$0xff]  ;;  %161 = vmatpush.msra.mxu2 %v45_v0  ;;  %v60_v3 = vld [vmem:[%s393_s1 + $0xf0] sm:$0xff]  ;;  %66 = vmatpush.msra.mxu0 %v45_v0  ;;  %v59_v5 = vld [vmem:[%s393_s1 + $0xe8] sm:$0xff] }
   0x3   :  { %177 = vmatpush.msra.mxu3 %v61_v2  ;;  %107 = vmatpush.msra.mxu1 %v61_v2  ;;  %v42_v6 = vld [vmem:[%s393_s1 + $0x60] sm:$0xff]  ;;  %v41_v8 = vld [vmem:[%s393_s1 + $0x58] sm:$0xff]  ;;  %v40_v10 = vld [vmem:[%s393_s1 + $0x50] sm:$0xff] }
   0x4   :  { %162 = vmatpush.msra.mxu2 %v44_v1  ;;  %67 = vmatpush.msra.mxu0 %v44_v1  ;;  %v58_v7 = vld [vmem:[%s393_s1 + $0xe0] sm:$0xff]  ;;  %v57_v9 = vld [vmem:[%s393_s1 + $0xd8] sm:$0xff]  ;;  %v56_v11 = vld [vmem:[%s393_s1 + $0xd0] sm:$0xff] }
   0x5   :  { %178 = vmatpush.msra.mxu3 %v60_v3  ;;  %108 = vmatpush.msra.mxu1 %v60_v3  ;;  %v39_v12 = vld [vmem:[%s393_s1 + $0x48] sm:$0xff]  ;;  %v38_v14 = vld [vmem:[%s393_s1 + $0x40] sm:$0xff]  ;;  %v37_v16 = vld [vmem:[%s393_s1 + $0x38] sm:$0xff] }
   0x6   :  { %163 = vmatpush.msra.mxu2 %v43_v4  ;;  %68 = vmatpush.msra.mxu0 %v43_v4  ;;  %v55_v13 = vld [vmem:[%s393_s1 + $0xc8] sm:$0xff]  ;;  %v54_v15 = vld [vmem:[%s393_s1 + $0xc0] sm:$0xff]  ;;  %v53_v17 = vld [vmem:[%s393_s1 + $0xb8] sm:$0xff] }
   0x7   :  { %179 = vmatpush.msra.mxu3 %v59_v5  ;;  %109 = vmatpush.msra.mxu1 %v59_v5  ;;  %v36_v18 = vld [vmem:[%s393_s1 + $0x30] sm:$0xff]  ;;  %v35_v20 = vld [vmem:[%s393_s1 + $0x28] sm:$0xff]  ;;  %v34_v22 = vld [vmem:[%s393_s1 + $0x20] sm:$0xff] }
   0x8   :  { %164 = vmatpush.msra.mxu2 %v42_v6  ;;  %69 = vmatpush.msra.mxu0 %v42_v6  ;;  %v52_v19 = vld [vmem:[%s393_s1 + $0xb0] sm:$0xff]  ;;  %v51_v21 = vld [vmem:[%s393_s1 + $0xa8] sm:$0xff]  ;;  %v50_v23 = vld [vmem:[%s393_s1 + $0xa0] sm:$0xff] }
   0x9   :  { %180 = vmatpush.msra.mxu3 %v58_v7  ;;  %110 = vmatpush.msra.mxu1 %v58_v7  ;;  %v33_v24 = vld [vmem:[%s393_s1 + $0x18] sm:$0xff]  ;;  %v32_v26 = vld [vmem:[%s393_s1 + $0x10] sm:$0xff]  ;;  %v31_v28 = vld [vmem:[%s393_s1 + $0x8] sm:$0xff] }
   0xa   :  { %165 = vmatpush.msra.mxu2 %v41_v8  ;;  %70 = vmatpush.msra.mxu0 %v41_v8  ;;  %v49_v25 = vld [vmem:[%s393_s1 + $0x98] sm:$0xff]  ;;  %v48_v27 = vld [vmem:[%s393_s1 + $0x90] sm:$0xff]  ;;  %v47_v29 = vld [vmem:[%s393_s1 + $0x88] sm:$0xff] }
   0xb   :  { %181 = vmatpush.msra.mxu3 %v57_v9  ;;  %111 = vmatpush.msra.mxu1 %v57_v9  ;;  %v30_v30 = vld [vmem:[%s393_s1] sm:$0xff]  ;;  %v23_v33 = vld [vmem:[%s395_s0 + $0x48] sm:$0xff]  ;;  %v24_v36 = vld [vmem:[%s395_s0 + $0x50] sm:$0xff] }
   0xc   :  { %166 = vmatpush.msra.mxu2 %v40_v10  ;;  %71 = vmatpush.msra.mxu0 %v40_v10  ;;  %v46_v31 = vld [vmem:[%s393_s1 + $0x80] sm:$0xff]  ;;  %v15_v35 = vld [vmem:[%s395_s0 + $0x8] sm:$0xff]  ;;  %v25_v37 = vld [vmem:[%s395_s0 + $0x58] sm:$0xff] }
   0xd   :  { %182 = vmatpush.msra.mxu3 %v56_v11  ;;  %112 = vmatpush.msra.mxu1 %v56_v11  ;;  %v22_v32 = vld [vmem:[%s395_s0 + $0x40] sm:$0xff]  ;;  %v16_v38 = vld [vmem:[%s395_s0 + $0x10] sm:$0xff]  ;;  %v17_v39 = vld [vmem:[%s395_s0 + $0x18] sm:$0xff] }
   0xe   :  { %167 = vmatpush.msra.mxu2 %v39_v12  ;;  %72 = vmatpush.msra.mxu0 %v39_v12  ;;  %v14_v34 = vld [vmem:[%s395_s0] sm:$0xff]  ;;  %v27_v41 = vld [vmem:[%s395_s0 + $0x68] sm:$0xff]  ;;  %v28_v44 = vld [vmem:[%s395_s0 + $0x70] sm:$0xff] }
   0xf   :  { %183 = vmatpush.msra.mxu3 %v55_v13  ;;  %113 = vmatpush.msra.mxu1 %v55_v13  ;;  %v26_v40 = vld [vmem:[%s395_s0 + $0x60] sm:$0xff]  ;;  %v19_v43 = vld [vmem:[%s395_s0 + $0x28] sm:$0xff]  ;;  %v29_v45 = vld [vmem:[%s395_s0 + $0x78] sm:$0xff] }
  0x10   :  { %168 = vmatpush.msra.mxu2 %v38_v14  ;;  %73 = vmatpush.msra.mxu0 %v38_v14  ;;  %v18_v42 = vld [vmem:[%s395_s0 + $0x20] sm:$0xff]  ;;  %v20_v46 = vld [vmem:[%s395_s0 + $0x30] sm:$0xff]  ;;  %v21_v47 = vld [vmem:[%s395_s0 + $0x38] sm:$0xff] }
  0x11   :  { %184 = vmatpush.msra.mxu3 %v54_v15  ;;  %114 = vmatpush.msra.mxu1 %v54_v15  ;;  %v193_v48 = vld [vmem:[%s394_s2] ss:$0 sm:$0xff] }
  0x12   :  { %169 = vmatpush.msra.mxu2 %v37_v16  ;;  %74 = vmatpush.msra.mxu0 %v37_v16 }
  0x13   :  { %185 = vmatpush.msra.mxu3 %v53_v17  ;;  %115 = vmatpush.msra.mxu1 %v53_v17 }
  0x14   :  { %170 = vmatpush.msra.mxu2 %v36_v18  ;;  %75 = vmatpush.msra.mxu0 %v36_v18 }
  0x15   :  { %186 = vmatpush.msra.mxu3 %v52_v19  ;;  %116 = vmatpush.msra.mxu1 %v52_v19 }
  0x16   :  { %171 = vmatpush.msra.mxu2 %v35_v20  ;;  %76 = vmatpush.msra.mxu0 %v35_v20 }
  0x17   :  { %187 = vmatpush.msra.mxu3 %v51_v21  ;;  %117 = vmatpush.msra.mxu1 %v51_v21 }
  0x18   :  { %172 = vmatpush.msra.mxu2 %v34_v22  ;;  %77 = vmatpush.msra.mxu0 %v34_v22 }
  0x19   :  { %188 = vmatpush.msra.mxu3 %v50_v23  ;;  %118 = vmatpush.msra.mxu1 %v50_v23 }
  0x1a   :  { %173 = vmatpush.msra.mxu2 %v33_v24  ;;  %78 = vmatpush.msra.mxu0 %v33_v24 }
  0x1b   :  { %189 = vmatpush.msra.mxu3 %v49_v25  ;;  %119 = vmatpush.msra.mxu1 %v49_v25 }
  0x1c   :  { %174 = vmatpush.msra.mxu2 %v32_v26  ;;  %79 = vmatpush.msra.mxu0 %v32_v26 }
  0x1d   :  { %190 = vmatpush.msra.mxu3 %v48_v27  ;;  %120 = vmatpush.msra.mxu1 %v48_v27 }
  0x1e   :  { %175 = vmatpush.msra.mxu2 %v31_v28  ;;  %80 = vmatpush.msra.mxu0 %v31_v28 }
  0x1f   :  { %191 = vmatpush.msra.mxu3 %v47_v29  ;;  %121 = vmatpush.msra.mxu1 %v47_v29 }
  0x20   :  { %176 = vmatpush.msra.mxu2 %v30_v30  ;;  %81 = vmatpush.msra.mxu0 %v30_v30 }
  0x21   :  { %192 = vmatpush.msra.mxu3 %v46_v31  ;;  %94 = vmatmul.f32.vlgmr.msra.gmra.mxu2 %v22_v32 }
  0x22   :  { %135 = vmatmul.f32.vlgmr.msra.gmra.mxu3 %v23_v33  ;;  %122 = vmatpush.msra.mxu1 %v46_v31 }
  0x23   :  { %82 = vmatmul.f32.vlgmr.msra.gmra.mxu0 %v14_v34  ;;  %123 = vmatmul.f32.vlgmr.msra.gmra.mxu1 %v15_v35 }
  0x29   :  { %97 = vmatmul.f32.gmra.mxu2 %v24_v36 }
  0x2a   :  { %138 = vmatmul.f32.gmra.mxu3 %v25_v37 }
  0x2b   :  { %85 = vmatmul.f32.gmra.mxu0 %v16_v38  ;;  %126 = vmatmul.f32.gmra.mxu1 %v17_v39 }
  0x31   :  { %100 = vmatmul.f32.gmra.mxu2 %v26_v40 }
  0x32   :  { %141 = vmatmul.f32.gmra.mxu3 %v27_v41 }
  0x33   :  { %88 = vmatmul.f32.gmra.mxu0 %v18_v42  ;;  %129 = vmatmul.f32.gmra.mxu1 %v19_v43 }
  0x39   :  { %103 = vmatmul.f32.gmra.mxu2 %v28_v44 }
  0x3a   :  { %144 = vmatmul.f32.gmra.mxu3 %v29_v45 }
  0x3b   :  { %91 = vmatmul.f32.gmra.mxu0 %v20_v46  ;;  %132 = vmatmul.f32.gmra.mxu1 %v21_v47 }
  0xa0   :  { %v83_v49 = vpop.f32.mrf.mxu0  ;;  %v124_v50 = vpop.f32.mrf.mxu1 }
  0xa1   :  { %v84_v51 = vadd.f32 %v193_v48, %v83_v49 }
  0xa3   :  { %v125_v52 = vadd.f32 %v124_v50, %v84_v51 }
  0xa4   :  { %v95_v53 = vpop.f32.mrf.mxu2 }
  0xa5   :  { %v136_v54 = vpop.f32.mrf.mxu3  ;;  %v96_v55 = vadd.f32 %v193_v48, %v95_v53  ;;  %149 = vst.msk [vmem:[%s396_s3] sm:$0xff] %vm148_vm0, %v125_v52 }
  0xa7   :  { %v137_v56 = vadd.f32 %v136_v54, %v96_v55 }
  0xa8   :  { %v86_v57 = vpop.f32.mrf.mxu0  ;;  %v127_v58 = vpop.f32.mrf.mxu1 }
  0xa9   :  { %153 = vst.msk [vmem:[%s396_s3 + $0x20] sm:$0xff] %vm148_vm0, %v137_v56  ;;  %v87_v59 = vadd.f32 %v193_v48, %v86_v57 }
  0xab   :  { %v128_v60 = vadd.f32 %v127_v58, %v87_v59 }
  0xac   :  { %v98_v61 = vpop.f32.mrf.mxu2 }
  0xad   :  { %v139_v62 = vpop.f32.mrf.mxu3  ;;  %v99_v63 = vadd.f32 %v193_v48, %v98_v61  ;;  %150 = vst.msk [vmem:[%s396_s3 + $0x8] sm:$0xff] %vm148_vm0, %v128_v60 }
  0xaf   :  { %v140_v0 = vadd.f32 %v139_v62, %v99_v63 }
  0xb0   :  { %v89_v1 = vpop.f32.mrf.mxu0  ;;  %v130_v2 = vpop.f32.mrf.mxu1 }
  0xb1   :  { %154 = vst.msk [vmem:[%s396_s3 + $0x28] sm:$0xff] %vm148_vm0, %v140_v0  ;;  %v90_v3 = vadd.f32 %v193_v48, %v89_v1 }
  0xb3   :  { %v131_v4 = vadd.f32 %v130_v2, %v90_v3 }
  0xb4   :  { %v101_v5 = vpop.f32.mrf.mxu2 }
  0xb5   :  { %v142_v6 = vpop.f32.mrf.mxu3  ;;  %v102_v7 = vadd.f32 %v193_v48, %v101_v5  ;;  %151 = vst.msk [vmem:[%s396_s3 + $0x10] sm:$0xff] %vm148_vm0, %v131_v4 }
  0xb7   :  { %v143_v8 = vadd.f32 %v142_v6, %v102_v7 }
  0xb8   :  { %v92_v9 = vpop.f32.mrf.mxu0  ;;  %v133_v10 = vpop.f32.mrf.mxu1 }
  0xb9   :  { %155 = vst.msk [vmem:[%s396_s3 + $0x30] sm:$0xff] %vm148_vm0, %v143_v8  ;;  %v93_v11 = vadd.f32 %v193_v48, %v92_v9 }
  0xbb   :  { %v134_v12 = vadd.f32 %v133_v10, %v93_v11 }
  0xbc   :  { %v104_v13 = vpop.f32.mrf.mxu2 }
  0xbd   :  { %v145_v14 = vpop.f32.mrf.mxu3  ;;  %v105_v15 = vadd.f32 %v193_v48, %v104_v13  ;;  %152 = vst.msk [vmem:[%s396_s3 + $0x18] sm:$0xff] %vm148_vm0, %v134_v12 }
  0xbf   :  { %v146_v16 = vadd.f32 %v145_v14, %v105_v15 }
  0xc1   :  { %156 = vst.msk [vmem:[%s396_s3 + $0x38] sm:$0xff] %vm148_vm0, %v146_v16 }

</bundles_post_ra>
